<compile_context>
chip_gen: v6e
topology: v6e:2x2x1
jax: 0.10.0
libtpu: 0.0.40
codegen_flags: <defaults>
</compile_context>

<pallas_src>
import functools
import numpy as np
import jax
import jax.numpy as jnp
from jax.experimental import pallas as pl
from jax.experimental.pallas import tpu as pltpu


# ----------------------------------------------------------------------------
# Parameter construction (matches VectorMapTransposeConv.__init__ shapes)
# ----------------------------------------------------------------------------
def build_c_weight(d):
    c = np.ones((d, d), dtype=np.float32)
    for i in range(1, d):
        pos_ind = i + i if i + i < d else i + i - d
        neg_inds = [j for j in range(d) if j != i and j != pos_ind]
        c[i, neg_inds] = -1.0
    return c


def build_full_weight(v_weight, c_weight):
    """(D, in_per, out_per, kh, kw) -> (D*in_per, D*out_per, kh, kw)."""
    d = v_weight.shape[0]
    rows = []
    for i in range(d):
        blocks = [c_weight[i, j] * v_weight[(j - i) % d] for j in range(d)]
        rows.append(jnp.concatenate(blocks, axis=1))   # concat over out_per blocks
    return jnp.concatenate(rows, axis=0)               # concat over in_per blocks


# ----------------------------------------------------------------------------
# Pallas kernel: one output parity phase, one batch element per grid step.
# ----------------------------------------------------------------------------
def _phase_kernel(x_ref, w_ref, b_ref, o_ref, *, oh_p, ow_p, cin, offs_h, offs_w):
    """
    x_ref : (1, Hp, Wp*Cin)          lane-dense padded input slab for this image
    w_ref : (T, OWp*Cin, OWp*Cout)   block-diagonal per-tap weights (resident)
    b_ref : (1, OWp*Cout)            bias replicated along OWp (resident)
    o_ref : (1, OHp, OWp*Cout)       lane-dense output slab
    """
    acc = None
    t = 0
    for oh_off in offs_h:                       # fully unrolled: <= ceil(kh/stride)
        for ow_off in offs_w:                   #                 <= ceil(kw/stride)
            patch = x_ref[0, pl.ds(oh_off, oh_p), pl.ds(ow_off * cin, ow_p * cin)]
            contrib = jnp.dot(patch, w_ref[t],
                              preferred_element_type=jnp.float32)
            acc = contrib if acc is None else acc + contrib
            t += 1
    # single lane-dense store, bias folded in
    o_ref[0] = (acc + b_ref[...]).astype(o_ref.dtype)


def _phase_conv(x_nhwc, w_full, bias, taps_h, taps_w, oh_p, ow_p):
    """Stride-1 conv for one output parity phase, as one pallas_call."""
    n, h, w_in, cin = x_nhwc.shape
    cout = w_full.shape[1]

    offs_h = [o for _, o in taps_h]
    offs_w = [o for _, o in taps_w]
    pad_lo_h = max(0, -min(offs_h))
    pad_hi_h = max(0, (oh_p - 1) + max(offs_h) - (h - 1))
    pad_lo_w = max(0, -min(offs_w))
    pad_hi_w = max(0, (ow_p - 1) + max(offs_w) - (w_in - 1))

    xp = jnp.pad(x_nhwc, ((0, 0), (pad_lo_h, pad_hi_h),
                          (pad_lo_w, pad_hi_w), (0, 0)))
    hp = h + pad_lo_h + pad_hi_h
    wp = w_in + pad_lo_w + pad_hi_w
    xp_wide = xp.reshape(n, hp, wp * cin)                   # lane-dense input

    sh = tuple(o + pad_lo_h for o in offs_h)                # static, >= 0
    sw = tuple(o + pad_lo_w for o in offs_w)

    # Block-diagonal per-tap weights: kron(I_OWp, W_tap) -> (OWp*Cin, OWp*Cout).
    # TODO(synk): width-tile this (TW ~ 16) for very wide images so the
    # block-diagonal weight / VMEM footprint stays bounded.
    eye = jnp.eye(ow_p, dtype=jnp.float32)
    w_list = []
    for a, _ in taps_h:
        for b, _ in taps_w:
            w_list.append(jnp.kron(eye, w_full[:, :, a, b].astype(jnp.float32)))
    w_stack = jnp.stack(w_list, axis=0)                     # (T, OWp*Cin, OWp*Cout)
    bias_wide = jnp.tile(bias.astype(jnp.float32), ow_p).reshape(1, ow_p * cout)

    kern = functools.partial(_phase_kernel, oh_p=oh_p, ow_p=ow_p, cin=cin,
                             offs_h=sh, offs_w=sw)
    # TODO(synk): halo-aware row tiling of the per-image input block for very
    # large spatial extents (current block = one padded image per grid step).
    out_wide = pl.pallas_call(
        kern,
        out_shape=jax.ShapeDtypeStruct((n, oh_p, ow_p * cout), jnp.float32),
        grid_spec=pltpu.PrefetchScalarGridSpec(
            num_scalar_prefetch=0,
            grid=(n,),                                      # batch-parallel
            in_specs=[
                pl.BlockSpec((1, hp, wp * cin), lambda i: (i, 0, 0)),
                pl.BlockSpec(w_stack.shape, lambda i: (0, 0, 0)),   # resident
                pl.BlockSpec(bias_wide.shape, lambda i: (0, 0)),    # resident
            ],
            out_specs=pl.BlockSpec((1, oh_p, ow_p * cout), lambda i: (i, 0, 0)),
        ),
        compiler_params=pltpu.CompilerParams(
            dimension_semantics=("parallel",)),             # v7x: use both TCs
    )(xp_wide, w_stack, bias_wide)

    return out_wide.reshape(n, oh_p, ow_p, cout)


# ----------------------------------------------------------------------------
# Full transposed conv via sub-pixel (phase) decomposition
# ----------------------------------------------------------------------------
def vectormap_transpose_conv2d(x_nchw, v_weight, c_weight, bias, stride,
                               padding, output_padding, groups, dilation):
    assert groups == 1, "only groups=1 supported"
    w_full = build_full_weight(v_weight, c_weight)      # (Cin, Cout, kh, kw)
    cin, cout, kh, kw = w_full.shape
    n, cin_x, h, w_in = x_nchw.shape
    assert cin_x == cin

    oh = (h - 1) * stride - 2 * padding + dilation * (kh - 1) + output_padding + 1
    ow = (w_in - 1) * stride - 2 * padding + dilation * (kw - 1) + output_padding + 1

    x = jnp.transpose(x_nchw, (0, 2, 3, 1)).astype(jnp.float32)   # NHWC
    if bias is None:
        bias = jnp.zeros((cout,), jnp.float32)

    out = jnp.zeros((n, oh, ow, cout), jnp.float32)
    for ph in range(stride):
        oh_p = max(0, -(-(oh - ph) // stride))          # ceil((oh - ph)/stride)
        if oh_p == 0:
            continue
        taps_h = [(a, (ph + padding - a * dilation) // stride)
                  for a in range(kh)
                  if (ph + padding - a * dilation) % stride == 0]
        for pw in range(stride):
            ow_p = max(0, -(-(ow - pw) // stride))
            if ow_p == 0:
                continue
            taps_w = [(b, (pw + padding - b * dilation) // stride)
                      for b in range(kw)
                      if (pw + padding - b * dilation) % stride == 0]
            if not taps_h or not taps_w:
                phase_out = jnp.broadcast_to(
                    bias.astype(jnp.float32).reshape(1, 1, 1, cout),
                    (n, oh_p, ow_p, cout))
            else:
                phase_out = _phase_conv(x, w_full, bias, taps_h, taps_w,
                                        oh_p, ow_p)
            out = out.at[:, ph::stride, pw::stride, :].set(phase_out)

    return jnp.transpose(out, (0, 3, 1, 2))             # back to NCHW


# ----------------------------------------------------------------------------
# NumPy reference with exact F.conv_transpose2d scatter semantics
# ----------------------------------------------------------------------------
def ref_conv_transpose2d(x, w, bias, stride, padding, output_padding, dilation):
    n, cin, h, wi = x.shape
    _, cout, kh, kw = w.shape
    oh = (h - 1) * stride - 2 * padding + dilation * (kh - 1) + output_padding + 1
    ow = (wi - 1) * stride - 2 * padding + dilation * (kw - 1) + output_padding + 1
    out = np.zeros((n, cout, oh, ow), np.float32) + bias.reshape(1, cout, 1, 1)
    for nn in range(n):
        for ci in range(cin):
            for ih in range(h):
                for iw in range(wi):
                    v = x[nn, ci, ih, iw]
                    for a in range(kh):
                        oy = ih * stride - padding + a * dilation
                        if oy < 0 or oy >= oh:
                            continue
                        for b in range(kw):
                            ox = iw * stride - padding + b * dilation
                            if ox < 0 or ox >= ow:
                                continue
                            out[nn, :, oy, ox] += v * w[ci, :, a, b]
    return out


if __name__ == "__main__":
    # module config: vectormap_dim=4, in_channels=8, out_channels=8, k=3,
    # stride=2, padding=1, output_padding=1, dilation=1, groups=1, bias=True
    D, IN_CH, OUT_CH, K = 4, 8, 8, 3
    STRIDE, PAD, OUT_PAD, DIL, GROUPS = 2, 1, 1, 1, 1
    N, H, W = 2, 8, 8
    in_per, out_per = IN_CH // D, OUT_CH // D

    key = jax.random.PRNGKey(0)
    k1, k2, k3 = jax.random.split(key, 3)
    # TODO(synk): the module's vectormap/unitary init helpers are not in the
    # snippet; deterministic synthetic init is used (module zeroes the bias,
    # nonzero here to exercise the bias-add path).
    v_weight = 0.2 * jax.random.normal(k1, (D, in_per, out_per, K, K), jnp.float32)
    bias = 0.1 * jax.random.normal(k2, (OUT_CH,), jnp.float32)
    x = jax.random.normal(k3, (N, IN_CH, H, W), jnp.float32)
    c_weight = jnp.asarray(build_c_weight(D))

    conv = jax.jit(functools.partial(
        vectormap_transpose_conv2d, stride=STRIDE, padding=PAD,
        output_padding=OUT_PAD, groups=GROUPS, dilation=DIL))
    out = jax.block_until_ready(conv(x, v_weight, c_weight, bias))

    # reference built from the same assembled vectormap weight
    w_full_np = np.asarray(build_full_weight(v_weight, c_weight))
    ref = ref_conv_transpose2d(np.asarray(x), w_full_np, np.asarray(bias),
                               STRIDE, PAD, OUT_PAD, DIL)
    # Default (non-HIGHEST) MXU precision => bf16 operand rounding inside the
    # f32-accumulated matmuls; tolerance sized for that (outputs are O(1)).
    np.testing.assert_allclose(np.asarray(out), ref, rtol=2e-2, atol=2e-2)
    print("KERNEL_OK")
</pallas_src>

<mosaic_0001>
module attributes {stable_mosaic.version = 11 : i64} {
  func.func @_phase_kernel(%arg0: i32, %arg1: memref<1x9x72xf32, #tpu.memory_space<vmem>>, %arg2: memref<4x64x64xf32, #tpu.memory_space<vmem>>, %arg3: memref<1x64xf32, #tpu.memory_space<vmem>>, %arg4: memref<1x8x64xf32, #tpu.memory_space<vmem>>) attributes {dimension_semantics = [#tpu.dimension_semantics<parallel>], iteration_bounds = array<i64: 2>, scalar_prefetch = 0 : i64, scratch_operands = 0 : i64, tpu.core_type = #tpu.core_type<tc>, window_params = [{transform_indices = @transform_0, window_bounds = array<i64: 1, 9, 72>}, {pipeline_mode = #tpu.pipeline_mode<synchronous>, transform_indices = @transform_1, window_bounds = array<i64: 4, 64, 64>}, {pipeline_mode = #tpu.pipeline_mode<synchronous>, transform_indices = @transform_2, window_bounds = array<i64: 1, 64>}, {transform_indices = @transform_3, window_bounds = array<i64: 1, 8, 64>}]} {
    %c0 = arith.constant 0 : index
    %c1 = arith.constant 1 : index
    %c8 = arith.constant 8 : index
    %0 = vector.load %arg1[%c0, %c1, %c8] : memref<1x9x72xf32, #tpu.memory_space<vmem>>, vector<1x8x64xf32>
    %1 = vector.shape_cast %0 : vector<1x8x64xf32> to vector<8x64xf32>
    %c0_0 = arith.constant 0 : index
    %c0_1 = arith.constant 0 : index
    %c0_2 = arith.constant 0 : index
    %2 = vector.load %arg2[%c0_0, %c0_1, %c0_2] : memref<4x64x64xf32, #tpu.memory_space<vmem>>, vector<1x64x64xf32>
    %3 = vector.shape_cast %2 : vector<1x64x64xf32> to vector<64x64xf32>
    %cst = arith.constant dense<0.000000e+00> : vector<8x64xf32>
    %4 = tpu.matmul %1, %3, %cst {dimension_numbers = #tpu.dot_dimension_numbers<[1], [0], [0], [1], [0, 0, 1, 1], [], []>} : vector<8x64xf32>, vector<64x64xf32>, vector<8x64xf32> -> vector<8x64xf32>
    %c0_3 = arith.constant 0 : index
    %c1_4 = arith.constant 1 : index
    %c0_5 = arith.constant 0 : index
    %5 = vector.load %arg1[%c0_3, %c1_4, %c0_5] : memref<1x9x72xf32, #tpu.memory_space<vmem>>, vector<1x8x64xf32>
    %6 = vector.shape_cast %5 : vector<1x8x64xf32> to vector<8x64xf32>
    %c1_6 = arith.constant 1 : index
    %c0_7 = arith.constant 0 : index
    %c0_8 = arith.constant 0 : index
    %7 = vector.load %arg2[%c1_6, %c0_7, %c0_8] : memref<4x64x64xf32, #tpu.memory_space<vmem>>, vector<1x64x64xf32>
    %8 = vector.shape_cast %7 : vector<1x64x64xf32> to vector<64x64xf32>
    %cst_9 = arith.constant dense<0.000000e+00> : vector<8x64xf32>
    %9 = tpu.matmul %6, %8, %cst_9 {dimension_numbers = #tpu.dot_dimension_numbers<[1], [0], [0], [1], [0, 0, 1, 1], [], []>} : vector<8x64xf32>, vector<64x64xf32>, vector<8x64xf32> -> vector<8x64xf32>
    %10 = arith.addf %4, %9 : vector<8x64xf32>
    %c0_10 = arith.constant 0 : index
    %c0_11 = arith.constant 0 : index
    %c8_12 = arith.constant 8 : index
    %11 = vector.load %arg1[%c0_10, %c0_11, %c8_12] : memref<1x9x72xf32, #tpu.memory_space<vmem>>, vector<1x8x64xf32>
    %12 = vector.shape_cast %11 : vector<1x8x64xf32> to vector<8x64xf32>
    %c2 = arith.constant 2 : index
    %c0_13 = arith.constant 0 : index
    %c0_14 = arith.constant 0 : index
    %13 = vector.load %arg2[%c2, %c0_13, %c0_14] : memref<4x64x64xf32, #tpu.memory_space<vmem>>, vector<1x64x64xf32>
    %14 = vector.shape_cast %13 : vector<1x64x64xf32> to vector<64x64xf32>
    %cst_15 = arith.constant dense<0.000000e+00> : vector<8x64xf32>
    %15 = tpu.matmul %12, %14, %cst_15 {dimension_numbers = #tpu.dot_dimension_numbers<[1], [0], [0], [1], [0, 0, 1, 1], [], []>} : vector<8x64xf32>, vector<64x64xf32>, vector<8x64xf32> -> vector<8x64xf32>
    %16 = arith.addf %10, %15 : vector<8x64xf32>
    %c0_16 = arith.constant 0 : index
    %c0_17 = arith.constant 0 : index
    %c0_18 = arith.constant 0 : index
    %17 = vector.load %arg1[%c0_16, %c0_17, %c0_18] : memref<1x9x72xf32, #tpu.memory_space<vmem>>, vector<1x8x64xf32>
    %18 = vector.shape_cast %17 : vector<1x8x64xf32> to vector<8x64xf32>
    %c3 = arith.constant 3 : index
    %c0_19 = arith.constant 0 : index
    %c0_20 = arith.constant 0 : index
    %19 = vector.load %arg2[%c3, %c0_19, %c0_20] : memref<4x64x64xf32, #tpu.memory_space<vmem>>, vector<1x64x64xf32>
    %20 = vector.shape_cast %19 : vector<1x64x64xf32> to vector<64x64xf32>
    %cst_21 = arith.constant dense<0.000000e+00> : vector<8x64xf32>
    %21 = tpu.matmul %18, %20, %cst_21 {dimension_numbers = #tpu.dot_dimension_numbers<[1], [0], [0], [1], [0, 0, 1, 1], [], []>} : vector<8x64xf32>, vector<64x64xf32>, vector<8x64xf32> -> vector<8x64xf32>
    %22 = arith.addf %16, %21 : vector<8x64xf32>
    %c0_22 = arith.constant 0 : index
    %c0_23 = arith.constant 0 : index
    %23 = vector.load %arg3[%c0_22, %c0_23] : memref<1x64xf32, #tpu.memory_space<vmem>>, vector<1x64xf32>
    %24 = vector.broadcast %23 : vector<1x64xf32> to vector<8x64xf32>
    %25 = arith.addf %22, %24 : vector<8x64xf32>
    %c0_24 = arith.constant 0 : index
    %c0_25 = arith.constant 0 : index
    %c0_26 = arith.constant 0 : index
    %26 = vector.load %arg4[%c0_24, %c0_25, %c0_26] : memref<1x8x64xf32, #tpu.memory_space<vmem>>, vector<1x8x64xf32>
    %27 = vector.shape_cast %26 : vector<1x8x64xf32> to vector<8x64xf32>
    %28 = vector.shape_cast %25 : vector<8x64xf32> to vector<1x8x64xf32>
    tpu.vector_store %arg4[%c0_24, %c0_25, %c0_26], %28 {strides = array<i32>} : memref<1x8x64xf32, #tpu.memory_space<vmem>>, vector<1x8x64xf32>,
    return
  }
  func.func @transform_0(%arg0: i32) -> (i32, i32, i32) {
    %c0_i32 = arith.constant 0 : i32
    %c0_i32_0 = arith.constant 0 : i32
    %c0_i32_1 = arith.constant 0 : i32
    return %arg0, %c0_i32, %c0_i32_0 : i32, i32, i32
  }
  func.func @transform_1(%arg0: i32) -> (i32, i32, i32) {
    %c0_i32 = arith.constant 0 : i32
    %c0_i32_0 = arith.constant 0 : i32
    %c0_i32_1 = arith.constant 0 : i32
    %c0_i32_2 = arith.constant 0 : i32
    return %c0_i32, %c0_i32_0, %c0_i32_1 : i32, i32, i32
  }
  func.func @transform_2(%arg0: i32) -> (i32, i32) {
    %c0_i32 = arith.constant 0 : i32
    %c0_i32_0 = arith.constant 0 : i32
    %c0_i32_1 = arith.constant 0 : i32
    return %c0_i32, %c0_i32_0 : i32, i32
  }
  func.func @transform_3(%arg0: i32) -> (i32, i32, i32) {
    %c0_i32 = arith.constant 0 : i32
    %c0_i32_0 = arith.constant 0 : i32
    %c0_i32_1 = arith.constant 0 : i32
    return %arg0, %c0_i32, %c0_i32_0 : i32, i32, i32
  }
}

module attributes {stable_mosaic.version = 11 : i64} {
  func.func @_phase_kernel(%arg0: i32, %arg1: memref<1x9x64xf32, #tpu.memory_space<vmem>>, %arg2: memref<2x64x64xf32, #tpu.memory_space<vmem>>, %arg3: memref<1x64xf32, #tpu.memory_space<vmem>>, %arg4: memref<1x8x64xf32, #tpu.memory_space<vmem>>) attributes {dimension_semantics = [#tpu.dimension_semantics<parallel>], iteration_bounds = array<i64: 2>, scalar_prefetch = 0 : i64, scratch_operands = 0 : i64, tpu.core_type = #tpu.core_type<tc>, window_params = [{transform_indices = @transform_0, window_bounds = array<i64: 1, 9, 64>}, {pipeline_mode = #tpu.pipeline_mode<synchronous>, transform_indices = @transform_1, window_bounds = array<i64: 2, 64, 64>}, {pipeline_mode = #tpu.pipeline_mode<synchronous>, transform_indices = @transform_2, window_bounds = array<i64: 1, 64>}, {transform_indices = @transform_3, window_bounds = array<i64: 1, 8, 64>}]} {
    %c0 = arith.constant 0 : index
    %c1 = arith.constant 1 : index
    %c0_0 = arith.constant 0 : index
    %0 = vector.load %arg1[%c0, %c1, %c0_0] : memref<1x9x64xf32, #tpu.memory_space<vmem>>, vector<1x8x64xf32>
    %1 = vector.shape_cast %0 : vector<1x8x64xf32> to vector<8x64xf32>
    %c0_1 = arith.constant 0 : index
    %c0_2 = arith.constant 0 : index
    %c0_3 = arith.constant 0 : index
    %2 = vector.load %arg2[%c0_1, %c0_2, %c0_3] : memref<2x64x64xf32, #tpu.memory_space<vmem>>, vector<1x64x64xf32>
    %3 = vector.shape_cast %2 : vector<1x64x64xf32> to vector<64x64xf32>
    %cst = arith.constant dense<0.000000e+00> : vector<8x64xf32>
    %4 = tpu.matmul %1, %3, %cst {dimension_numbers = #tpu.dot_dimension_numbers<[1], [0], [0], [1], [0, 0, 1, 1], [], []>} : vector<8x64xf32>, vector<64x64xf32>, vector<8x64xf32> -> vector<8x64xf32>
    %c0_4 = arith.constant 0 : index
    %c0_5 = arith.constant 0 : index
    %c0_6 = arith.constant 0 : index
    %5 = vector.load %arg1[%c0_4, %c0_5, %c0_6] : memref<1x9x64xf32, #tpu.memory_space<vmem>>, vector<1x8x64xf32>
    %6 = vector.shape_cast %5 : vector<1x8x64xf32> to vector<8x64xf32>
    %c1_7 = arith.constant 1 : index
    %c0_8 = arith.constant 0 : index
    %c0_9 = arith.constant 0 : index
    %7 = vector.load %arg2[%c1_7, %c0_8, %c0_9] : memref<2x64x64xf32, #tpu.memory_space<vmem>>, vector<1x64x64xf32>
    %8 = vector.shape_cast %7 : vector<1x64x64xf32> to vector<64x64xf32>
    %cst_10 = arith.constant dense<0.000000e+00> : vector<8x64xf32>
    %9 = tpu.matmul %6, %8, %cst_10 {dimension_numbers = #tpu.dot_dimension_numbers<[1], [0], [0], [1], [0, 0, 1, 1], [], []>} : vector<8x64xf32>, vector<64x64xf32>, vector<8x64xf32> -> vector<8x64xf32>
    %10 = arith.addf %4, %9 : vector<8x64xf32>
    %c0_11 = arith.constant 0 : index
    %c0_12 = arith.constant 0 : index
    %11 = vector.load %arg3[%c0_11, %c0_12] : memref<1x64xf32, #tpu.memory_space<vmem>>, vector<1x64xf32>
    %12 = vector.broadcast %11 : vector<1x64xf32> to vector<8x64xf32>
    %13 = arith.addf %10, %12 : vector<8x64xf32>
    %c0_13 = arith.constant 0 : index
    %c0_14 = arith.constant 0 : index
    %c0_15 = arith.constant 0 : index
    %14 = vector.load %arg4[%c0_13, %c0_14, %c0_15] : memref<1x8x64xf32, #tpu.memory_space<vmem>>, vector<1x8x64xf32>
    %15 = vector.shape_cast %14 : vector<1x8x64xf32> to vector<8x64xf32>
    %16 = vector.shape_cast %13 : vector<8x64xf32> to vector<1x8x64xf32>
    tpu.vector_store %arg4[%c0_13, %c0_14, %c0_15], %16 {strides = array<i32>} : memref<1x8x64xf32, #tpu.memory_space<vmem>>, vector<1x8x64xf32>,
    return
  }
  func.func @transform_0(%arg0: i32) -> (i32, i32, i32) {
    %c0_i32 = arith.constant 0 : i32
    %c0_i32_0 = arith.constant 0 : i32
    %c0_i32_1 = arith.constant 0 : i32
    return %arg0, %c0_i32, %c0_i32_0 : i32, i32, i32
  }
  func.func @transform_1(%arg0: i32) -> (i32, i32, i32) {
    %c0_i32 = arith.constant 0 : i32
    %c0_i32_0 = arith.constant 0 : i32
    %c0_i32_1 = arith.constant 0 : i32
    %c0_i32_2 = arith.constant 0 : i32
    return %c0_i32, %c0_i32_0, %c0_i32_1 : i32, i32, i32
  }
  func.func @transform_2(%arg0: i32) -> (i32, i32) {
    %c0_i32 = arith.constant 0 : i32
    %c0_i32_0 = arith.constant 0 : i32
    %c0_i32_1 = arith.constant 0 : i32
    return %c0_i32, %c0_i32_0 : i32, i32
  }
  func.func @transform_3(%arg0: i32) -> (i32, i32, i32) {
    %c0_i32 = arith.constant 0 : i32
    %c0_i32_0 = arith.constant 0 : i32
    %c0_i32_1 = arith.constant 0 : i32
    return %arg0, %c0_i32, %c0_i32_0 : i32, i32, i32
  }
}

module attributes {stable_mosaic.version = 11 : i64} {
  func.func @_phase_kernel(%arg0: i32, %arg1: memref<1x8x72xf32, #tpu.memory_space<vmem>>, %arg2: memref<2x64x64xf32, #tpu.memory_space<vmem>>, %arg3: memref<1x64xf32, #tpu.memory_space<vmem>>, %arg4: memref<1x8x64xf32, #tpu.memory_space<vmem>>) attributes {dimension_semantics = [#tpu.dimension_semantics<parallel>], iteration_bounds = array<i64: 2>, scalar_prefetch = 0 : i64, scratch_operands = 0 : i64, tpu.core_type = #tpu.core_type<tc>, window_params = [{transform_indices = @transform_0, window_bounds = array<i64: 1, 8, 72>}, {pipeline_mode = #tpu.pipeline_mode<synchronous>, transform_indices = @transform_1, window_bounds = array<i64: 2, 64, 64>}, {pipeline_mode = #tpu.pipeline_mode<synchronous>, transform_indices = @transform_2, window_bounds = array<i64: 1, 64>}, {transform_indices = @transform_3, window_bounds = array<i64: 1, 8, 64>}]} {
    %c0 = arith.constant 0 : index
    %c0_0 = arith.constant 0 : index
    %c8 = arith.constant 8 : index
    %0 = vector.load %arg1[%c0, %c0_0, %c8] : memref<1x8x72xf32, #tpu.memory_space<vmem>>, vector<1x8x64xf32>
    %1 = vector.shape_cast %0 : vector<1x8x64xf32> to vector<8x64xf32>
    %c0_1 = arith.constant 0 : index
    %c0_2 = arith.constant 0 : index
    %c0_3 = arith.constant 0 : index
    %2 = vector.load %arg2[%c0_1, %c0_2, %c0_3] : memref<2x64x64xf32, #tpu.memory_space<vmem>>, vector<1x64x64xf32>
    %3 = vector.shape_cast %2 : vector<1x64x64xf32> to vector<64x64xf32>
    %cst = arith.constant dense<0.000000e+00> : vector<8x64xf32>
    %4 = tpu.matmul %1, %3, %cst {dimension_numbers = #tpu.dot_dimension_numbers<[1], [0], [0], [1], [0, 0, 1, 1], [], []>} : vector<8x64xf32>, vector<64x64xf32>, vector<8x64xf32> -> vector<8x64xf32>
    %c0_4 = arith.constant 0 : index
    %c0_5 = arith.constant 0 : index
    %c0_6 = arith.constant 0 : index
    %5 = vector.load %arg1[%c0_4, %c0_5, %c0_6] : memref<1x8x72xf32, #tpu.memory_space<vmem>>, vector<1x8x64xf32>
    %6 = vector.shape_cast %5 : vector<1x8x64xf32> to vector<8x64xf32>
    %c1 = arith.constant 1 : index
    %c0_7 = arith.constant 0 : index
    %c0_8 = arith.constant 0 : index
    %7 = vector.load %arg2[%c1, %c0_7, %c0_8] : memref<2x64x64xf32, #tpu.memory_space<vmem>>, vector<1x64x64xf32>
    %8 = vector.shape_cast %7 : vector<1x64x64xf32> to vector<64x64xf32>
    %cst_9 = arith.constant dense<0.000000e+00> : vector<8x64xf32>
    %9 = tpu.matmul %6, %8, %cst_9 {dimension_numbers = #tpu.dot_dimension_numbers<[1], [0], [0], [1], [0, 0, 1, 1], [], []>} : vector<8x64xf32>, vector<64x64xf32>, vector<8x64xf32> -> vector<8x64xf32>
    %10 = arith.addf %4, %9 : vector<8x64xf32>
    %c0_10 = arith.constant 0 : index
    %c0_11 = arith.constant 0 : index
    %11 = vector.load %arg3[%c0_10, %c0_11] : memref<1x64xf32, #tpu.memory_space<vmem>>, vector<1x64xf32>
    %12 = vector.broadcast %11 : vector<1x64xf32> to vector<8x64xf32>
    %13 = arith.addf %10, %12 : vector<8x64xf32>
    %c0_12 = arith.constant 0 : index
    %c0_13 = arith.constant 0 : index
    %c0_14 = arith.constant 0 : index
    %14 = vector.load %arg4[%c0_12, %c0_13, %c0_14] : memref<1x8x64xf32, #tpu.memory_space<vmem>>, vector<1x8x64xf32>
    %15 = vector.shape_cast %14 : vector<1x8x64xf32> to vector<8x64xf32>
    %16 = vector.shape_cast %13 : vector<8x64xf32> to vector<1x8x64xf32>
    tpu.vector_store %arg4[%c0_12, %c0_13, %c0_14], %16 {strides = array<i32>} : memref<1x8x64xf32, #tpu.memory_space<vmem>>, vector<1x8x64xf32>,
    return
  }
  func.func @transform_0(%arg0: i32) -> (i32, i32, i32) {
    %c0_i32 = arith.constant 0 : i32
    %c0_i32_0 = arith.constant 0 : i32
    %c0_i32_1 = arith.constant 0 : i32
    return %arg0, %c0_i32, %c0_i32_0 : i32, i32, i32
  }
  func.func @transform_1(%arg0: i32) -> (i32, i32, i32) {
    %c0_i32 = arith.constant 0 : i32
    %c0_i32_0 = arith.constant 0 : i32
    %c0_i32_1 = arith.constant 0 : i32
    %c0_i32_2 = arith.constant 0 : i32
    return %c0_i32, %c0_i32_0, %c0_i32_1 : i32, i32, i32
  }
  func.func @transform_2(%arg0: i32) -> (i32, i32) {
    %c0_i32 = arith.constant 0 : i32
    %c0_i32_0 = arith.constant 0 : i32
    %c0_i32_1 = arith.constant 0 : i32
    return %c0_i32, %c0_i32_0 : i32, i32
  }
  func.func @transform_3(%arg0: i32) -> (i32, i32, i32) {
    %c0_i32 = arith.constant 0 : i32
    %c0_i32_0 = arith.constant 0 : i32
    %c0_i32_1 = arith.constant 0 : i32
    return %arg0, %c0_i32, %c0_i32_0 : i32, i32, i32
  }
}

module attributes {stable_mosaic.version = 11 : i64} {
  func.func @_phase_kernel(%arg0: i32, %arg1: memref<1x8x64xf32, #tpu.memory_space<vmem>>, %arg2: memref<1x64x64xf32, #tpu.memory_space<vmem>>, %arg3: memref<1x64xf32, #tpu.memory_space<vmem>>, %arg4: memref<1x8x64xf32, #tpu.memory_space<vmem>>) attributes {dimension_semantics = [#tpu.dimension_semantics<parallel>], iteration_bounds = array<i64: 2>, scalar_prefetch = 0 : i64, scratch_operands = 0 : i64, tpu.core_type = #tpu.core_type<tc>, window_params = [{transform_indices = @transform_0, window_bounds = array<i64: 1, 8, 64>}, {pipeline_mode = #tpu.pipeline_mode<synchronous>, transform_indices = @transform_1, window_bounds = array<i64: 1, 64, 64>}, {pipeline_mode = #tpu.pipeline_mode<synchronous>, transform_indices = @transform_2, window_bounds = array<i64: 1, 64>}, {transform_indices = @transform_3, window_bounds = array<i64: 1, 8, 64>}]} {
    %c0 = arith.constant 0 : index
    %c0_0 = arith.constant 0 : index
    %c0_1 = arith.constant 0 : index
    %0 = vector.load %arg1[%c0, %c0_0, %c0_1] : memref<1x8x64xf32, #tpu.memory_space<vmem>>, vector<1x8x64xf32>
    %1 = vector.shape_cast %0 : vector<1x8x64xf32> to vector<8x64xf32>
    %c0_2 = arith.constant 0 : index
    %c0_3 = arith.constant 0 : index
    %c0_4 = arith.constant 0 : index
    %2 = vector.load %arg2[%c0_2, %c0_3, %c0_4] : memref<1x64x64xf32, #tpu.memory_space<vmem>>, vector<1x64x64xf32>
    %3 = vector.shape_cast %2 : vector<1x64x64xf32> to vector<64x64xf32>
    %cst = arith.constant dense<0.000000e+00> : vector<8x64xf32>
    %4 = tpu.matmul %1, %3, %cst {dimension_numbers = #tpu.dot_dimension_numbers<[1], [0], [0], [1], [0, 0, 1, 1], [], []>} : vector<8x64xf32>, vector<64x64xf32>, vector<8x64xf32> -> vector<8x64xf32>
    %c0_5 = arith.constant 0 : index
    %c0_6 = arith.constant 0 : index
    %5 = vector.load %arg3[%c0_5, %c0_6] : memref<1x64xf32, #tpu.memory_space<vmem>>, vector<1x64xf32>
    %6 = vector.broadcast %5 : vector<1x64xf32> to vector<8x64xf32>
    %7 = arith.addf %4, %6 : vector<8x64xf32>
    %c0_7 = arith.constant 0 : index
    %c0_8 = arith.constant 0 : index
    %c0_9 = arith.constant 0 : index
    %8 = vector.load %arg4[%c0_7, %c0_8, %c0_9] : memref<1x8x64xf32, #tpu.memory_space<vmem>>, vector<1x8x64xf32>
    %9 = vector.shape_cast %8 : vector<1x8x64xf32> to vector<8x64xf32>
    %10 = vector.shape_cast %7 : vector<8x64xf32> to vector<1x8x64xf32>
    tpu.vector_store %arg4[%c0_7, %c0_8, %c0_9], %10 {strides = array<i32>} : memref<1x8x64xf32, #tpu.memory_space<vmem>>, vector<1x8x64xf32>,
    return
  }
  func.func @transform_0(%arg0: i32) -> (i32, i32, i32) {
    %c0_i32 = arith.constant 0 : i32
    %c0_i32_0 = arith.constant 0 : i32
    %c0_i32_1 = arith.constant 0 : i32
    return %arg0, %c0_i32, %c0_i32_0 : i32, i32, i32
  }
  func.func @transform_1(%arg0: i32) -> (i32, i32, i32) {
    %c0_i32 = arith.constant 0 : i32
    %c0_i32_0 = arith.constant 0 : i32
    %c0_i32_1 = arith.constant 0 : i32
    %c0_i32_2 = arith.constant 0 : i32
    return %c0_i32, %c0_i32_0, %c0_i32_1 : i32, i32, i32
  }
  func.func @transform_2(%arg0: i32) -> (i32, i32) {
    %c0_i32 = arith.constant 0 : i32
    %c0_i32_0 = arith.constant 0 : i32
    %c0_i32_1 = arith.constant 0 : i32
    return %c0_i32, %c0_i32_0 : i32, i32
  }
  func.func @transform_3(%arg0: i32) -> (i32, i32, i32) {
    %c0_i32 = arith.constant 0 : i32
    %c0_i32_0 = arith.constant 0 : i32
    %c0_i32_1 = arith.constant 0 : i32
    return %arg0, %c0_i32, %c0_i32_0 : i32, i32, i32
  }
}

</mosaic_0001>

<bundles_post_ra>
// kernel: tile.23
= control target key start
LH: loop header
LB: loop body
LE: loop exit
PB: predicated region body
PF: predicated region fallthrough
CT: control target
= control target key end

     0   :  { %s22_s0 = inlined_call_operand.vmem [shape: f32[8], index: 0, kind: input, shape index: {}]   ;;  %s23_s1 = inlined_call_operand.vmem [shape: f32[8,8], index: 1, kind: output, shape index: {}]  }
   0x1   :  { %v4_v0 = vld [vmem:[%s22_s0] ss:$0 sm:$0xff] }
   0x2   :  { %5 = vst [vmem:[%s23_s1] sm:$0xff] %v4_v0 }

// kernel: tile.24
= control target key start
LH: loop header
LB: loop body
LE: loop exit
PB: predicated region body
PF: predicated region fallthrough
CT: control target
= control target key end

     0   :  { %s69_s10 = smov 56   ;;  %s70_s11 = smov 40   ;;  %vm3_vm0 = vcmask 64512   ;;  %vm9_vm1 = vcmask 523712   ;;  %vm15_vm2 = vcmask 458112   ;;  %vm21_vm3 = vcmask 392512   ;;  %s113_s0 = inlined_call_operand.vmem [shape: f32[8,8], index: 0, kind: input, shape index: {}]   ;;  %s114_s1 = inlined_call_operand.vmem [shape: f32[1,64], index: 1, kind: output, shape index: {}]  }
   0x1   :  { %v55_v0 = vld [vmem:[%s113_s0 + $0x7] sm:$0x1]   ;;  %v57_v1 = vld [vmem:[%s113_s0 + $0x5] sm:$0x1]   ;;  %v56_v2 = vld [vmem:[%s113_s0 + $0x6] sm:$0x1]  }
   0x2   :  { %7 = vrot.lane.b32.xlu0 %v55_v0, %s69_s10  ;;  %19 = vrot.lane.b32.xlu1 %v57_v1, %s70_s11  ;;  %v58_v3 = vld [vmem:[%s113_s0 + $0x4] sm:$0x1]   ;;  %v2_v4 = vld [vmem:[%s113_s0] sm:$0x1]   ;;  %s71_s18 = smov 48   ;;  %s72_s19 = smov 32  }
   0x3   :  { %4 = vst.msk [vmem:[#allocation0] sm:$0x1] %vm3_vm0, %v2_v4   ;;  %v59_v5 = vld [vmem:[%s113_s0 + $0x3] sm:$0x1]   ;;  %v60_v6 = vld [vmem:[%s113_s0 + $0x2] sm:$0x1]  }
   0x4   :  { %s73_s24 = smov 24   ;;  %s74_s25 = smov 16   ;;  %v61_v7 = vld [vmem:[%s113_s0 + $0x1] sm:$0x1]   ;;  %vm27_vm4 = vcmask 326912   ;;  %vm33_vm5 = vcmask 261312  }
   0x5   :  { %s75_s0 = smov 8   ;;  %vm39_vm6 = vcmask 195712   ;;  %vm45_vm7 = vcmask 130112  }
   0x6   :  { %13 = vrot.lane.b32.xlu0 %v56_v2, %s71_s18  ;;  %25 = vrot.lane.b32.xlu1 %v58_v3, %s72_s19 }
   0xa   :  { %31 = vrot.lane.b32.xlu0 %v59_v5, %s73_s24  ;;  %37 = vrot.lane.b32.xlu1 %v60_v6, %s74_s25 }
   0xe   :  { %43 = vrot.lane.b32.xlu0 %v61_v7, %s75_s0 }
  0x74   :  { %v8_v8 = vpop.permute.xlu0 %7   ;;  %v20_v9 = vpop.permute.xlu1 %19  }
  0x75   :  { %10 = vst.msk [vmem:[#allocation0] sm:$0x1] %vm9_vm1, %v8_v8  }
  0x78   :  { %v14_v10 = vpop.permute.xlu0 %13   ;;  %v26_v11 = vpop.permute.xlu1 %25  }
  0x79   :  { %16 = vst.msk [vmem:[#allocation0] sm:$0x1] %vm15_vm2, %v14_v10  }
  0x7a   :  { %22 = vst.msk [vmem:[#allocation0] sm:$0x1] %vm21_vm3, %v20_v9  }
  0x7b   :  { %28 = vst.msk [vmem:[#allocation0] sm:$0x1] %vm27_vm4, %v26_v11  }
  0x7c   :  { %v32_v12 = vpop.permute.xlu0 %31   ;;  %v38_v13 = vpop.permute.xlu1 %37  }
  0x7d   :  { %34 = vst.msk [vmem:[#allocation0] sm:$0x1] %vm33_vm5, %v32_v12  }
  0x7e   :  { %40 = vst.msk [vmem:[#allocation0] sm:$0x1] %vm39_vm6, %v38_v13  }
  0x80   :  { %v44_v14 = vpop.permute.xlu0 %43  }
  0x81   :  { %46 = vst.msk [vmem:[#allocation0] sm:$0x1] %vm45_vm7, %v44_v14  }
  0x88   :  { %v51_v15 = vld [vmem:[#allocation0] sm:$0x1] }
  0x89   :  { %54 = vst [vmem:[%s114_s1] sm:$0x1] %v51_v15 }

// kernel: vectormap_transpose_conv2d.7
= control target key start
LH: loop header
LB: loop body
LE: loop exit
PB: predicated region body
PF: predicated region fallthrough
CT: control target
= control target key end

     0   :  { %s759_s12 = smov 0   ;;  %s928_s0 = inlined_call_operand.vmem [shape: f32[2,9,72], index: 0, kind: input, shape index: {}]   ;;  %s929_s1 = inlined_call_operand.vmem [shape: f32[4,64,64], index: 1, kind: input, shape index: {}]   ;;  %s930_s2 = inlined_call_operand.vmem [shape: f32[1,64], index: 2, kind: input, shape index: {}]   ;;  %s931_s3 = inlined_call_operand.vmem [shape: f32[2,8,64], index: 3, kind: output, shape index: {}]  }
   0x1 LB: > { %s565_s13 = sadd.s32 4294967295, %s734_s12   ;;  %p569_p0 = scmp.ge.s32.totalorder %s734_s12, 1  ;;  %s734_s12 = sphi %s759_s12, %s13_s12  }
   0x2   : > { %p137_p1 = scmp.lt.s32.totalorder %s734_s12, 3 }
   0x4   : > { %p138_p2 = pnand %p569_p0, %p137_p1 }
   0x5   : > { %p160_p3 = scmp.lt.s32.totalorder (!%p138_p2), %s565_s13, 1  ;;  %s738_s5 = smov (!%p138_p2), 120  }
   0x6   : > { %141 = sbr.rel (%p138_p2) target bundleno = 347 (0x15b), region = 32 }
   0xb   : > { %v580_v0 = vld [vmem:[%s929_s1 + $0x78] sm:$0xff]  ;;  %v736_v1 = vmov 0.0   ;;  %v579_v2 = vld [vmem:[%s929_s1 + $0x70] sm:$0xff]  ;;  %s933_s13 = smov (!%p160_p3, %s565_s13), 1  ;;  %vm737_vm0 = vmmov 0   ;;  %v578_v5 = vld [vmem:[%s929_s1 + $0x68] sm:$0xff] }
   0xc   : > { %641 = vmatprep.subr.mxu0 %v736_v1  ;;  %660 = vmatprep.subr.mxu1 %v736_v1  ;;  %v177_v3 = vld [vmem:[%s929_s1 + $0x38] sm:$0xff]  ;;  %v176_v4 = vld [vmem:[%s929_s1 + $0x30] sm:$0xff]  ;;  %s604_s24 = sshll.u32 %s933_s13, 4  ;;  %v577_v6 = vld [vmem:[%s929_s1 + $0x60] sm:$0xff]  ;;  %vm187_vm1 = vcmask 523264   ;;  %s572_s6 = sshll.u32 %s933_s13, 3 }
   0xd   : > { %642 = vmatpush3.msra.mxu0 %v580_v0  ;;  %657 = vmatprep.mubr.msk.f32.mxu0 %vm737_vm0, %v736_v1  ;;  %s164_s27 = scalar_lea.vmem %s928_s0, %s604_s24  ;;  %v175_v7 = vld [vmem:[%s929_s1 + $0x28] sm:$0xff]  ;;  %v576_v9 = vld [vmem:[%s929_s1 + $0x58] sm:$0xff]  ;;  %v174_v10 = vld [vmem:[%s929_s1 + $0x20] sm:$0xff]  ;;  %s168_s11 = scalar_lea.vmem %s931_s3, %s572_s6 }
   0xe   : > { %643 = vmatprep.subr.mxu0 %v736_v1  ;;  %661 = vmatpush3.msra.mxu1 %v177_v3  ;;  %v169_v8 = vld [vmem:[%s164_s27 + $0x1] sm:$0xff]  ;;  %v575_v12 = vld [vmem:[%s929_s1 + $0x50] sm:$0xff]  ;;  %v173_v13 = vld [vmem:[%s929_s1 + $0x18] sm:$0xff] }
   0xf   : > { %644 = vmatpush3.msra.mxu0 %v579_v2  ;;  %662 = vmatprep.subr.mxu1 %v736_v1  ;;  %v809_v11 = vld [vmem:[%s164_s27] sm:$0xff]  ;;  %v574_v14 = vld [vmem:[%s929_s1 + $0x48] sm:$0xff]  ;;  %v172_v15 = vld [vmem:[%s929_s1 + $0x10] sm:$0xff] }
  0x10   : > { %645 = vmatprep.subr.mxu0 %v736_v1  ;;  %663 = vmatpush3.msra.mxu1 %v176_v4  ;;  %v573_v16 = vld [vmem:[%s929_s1 + $0x40] sm:$0xff]  ;;  %v590_v17 = vld [vmem:[%s929_s1 + $0xb8] sm:$0xff]  ;;  %v171_v18 = vld [vmem:[%s929_s1 + $0x8] sm:$0xff] }
  0x11   : > { %646 = vmatpush3.msra.mxu0 %v578_v5  ;;  %664 = vmatprep.subr.mxu1 %v736_v1  ;;  %v589_v19 = vld [vmem:[%s929_s1 + $0xb0] sm:$0xff]  ;;  %v170_v20 = vld [vmem:[%s929_s1] sm:$0xff]  ;;  %v588_v21 = vld [vmem:[%s929_s1 + $0xa8] sm:$0xff] }
  0x12   : > { %261 = vrot.lane.b32.xlu0 %v169_v8, %s738_s5  ;;  %647 = vmatprep.subr.mxu0 %v736_v1  ;;  %v587_v22 = vld [vmem:[%s929_s1 + $0xa0] sm:$0xff]  ;;  %v586_v23 = vld [vmem:[%s929_s1 + $0x98] sm:$0xff]  ;;  %v585_v24 = vld [vmem:[%s929_s1 + $0x90] sm:$0xff] }
  0x13   : > { %648 = vmatpush3.msra.mxu0 %v577_v6  ;;  %665 = vmatpush3.msra.mxu1 %v175_v7  ;;  %v584_v25 = vld [vmem:[%s929_s1 + $0x88] sm:$0xff]  ;;  %v583_v26 = vld [vmem:[%s929_s1 + $0x80] sm:$0xff]  ;;  %v599_v27 = vld [vmem:[%s929_s1 + $0xf8] sm:$0xff] }
  0x14   : > { %649 = vmatprep.subr.mxu0 %v736_v1  ;;  %666 = vmatprep.subr.mxu1 %v736_v1  ;;  %v598_v29 = vld [vmem:[%s929_s1 + $0xf0] sm:$0xff]  ;;  %v597_v30 = vld [vmem:[%s929_s1 + $0xe8] sm:$0xff]  ;;  %v596_v32 = vld [vmem:[%s929_s1 + $0xe0] sm:$0xff] }
  0x15   : > { %650 = vmatpush3.msra.mxu0 %v576_v9  ;;  %667 = vmatpush3.msra.mxu1 %v174_v10  ;;  %v595_v33 = vld [vmem:[%s929_s1 + $0xd8] sm:$0xff]  ;;  %v594_v34 = vld [vmem:[%s929_s1 + $0xd0] sm:$0xff]  ;;  %v593_v35 = vld [vmem:[%s929_s1 + $0xc8] sm:$0xff] }
  0x16   : > { %346 = vrot.lane.b32.xlu0 %v809_v11, %s738_s5  ;;  %651 = vmatprep.subr.mxu0 %v736_v1  ;;  %v592_v36 = vld [vmem:[%s929_s1 + $0xc0] sm:$0xff] }
  0x17   : > { %652 = vmatpush3.msra.mxu0 %v575_v12  ;;  %668 = vmatprep.subr.mxu1 %v736_v1  ;;  %v601_v46 = vld [vmem:[%s930_s2] ss:$0 sm:$0xff] }
  0x18   : > { %653 = vmatprep.subr.mxu0 %v736_v1  ;;  %669 = vmatpush3.msra.mxu1 %v173_v13 }
  0x19   : > { %654 = vmatpush3.msra.mxu0 %v574_v14  ;;  %670 = vmatprep.subr.mxu1 %v736_v1 }
  0x1a   : > { %655 = vmatprep.subr.mxu0 %v736_v1  ;;  %671 = vmatpush3.msra.mxu1 %v172_v15 }
  0x1b   : > { %656 = vmatpush3.msra.mxu0 %v573_v16  ;;  %672 = vmatprep.subr.mxu1 %v736_v1 }
  0x1c   : > { %679 = vmatprep.subr.mxu0 %v736_v1  ;;  %658 = vmatmul.mubr.msk.f32.vlgmr.msra.gmra.mxu0 %vm187_vm1, %v169_v8 }
  0x1d   : > { %680 = vmatpush3.msra.mxu0 %v590_v17  ;;  %673 = vmatpush3.msra.mxu1 %v171_v18 }
  0x1e   : > { %681 = vmatprep.subr.mxu0 %v736_v1  ;;  %674 = vmatprep.subr.mxu1 %v736_v1 }
  0x1f   : > { %682 = vmatpush3.msra.mxu0 %v589_v19  ;;  %675 = vmatpush3.msra.mxu1 %v170_v20 }
  0x20   : > { %683 = vmatprep.subr.mxu0 %v736_v1  ;;  %676 = vmatprep.mubr.msk.f32.mxu1 %vm737_vm0, %v736_v1 }
  0x21   : > { %684 = vmatpush3.msra.mxu0 %v588_v21  ;;  %698 = vmatprep.subr.mxu1 %v736_v1 }
  0x22   : > { %685 = vmatprep.subr.mxu0 %v736_v1  ;;  %695 = vmatprep.mubr.msk.f32.mxu0 %vm737_vm0, %v736_v1 }
  0x23   : > { %686 = vmatpush3.msra.mxu0 %v587_v22 }
  0x24   : > { %687 = vmatprep.subr.mxu0 %v736_v1 }
  0x25   : > { %688 = vmatpush3.msra.mxu0 %v586_v23 }
  0x26   : > { %689 = vmatprep.subr.mxu0 %v736_v1 }
  0x27   : > { %690 = vmatpush3.msra.mxu0 %v585_v24 }
  0x28   : > { %691 = vmatprep.subr.mxu0 %v736_v1 }
  0x29   : > { %692 = vmatpush3.msra.mxu0 %v584_v25 }
  0x2a   : > { %693 = vmatprep.subr.mxu0 %v736_v1 }
  0x2b   : > { %694 = vmatpush3.msra.mxu0 %v583_v26 }
  0x84   : > { %v262_v28 = vpop.permute.xlu0 %261 }
  0x85   : > { %677 = vmatmul.mubr.msk.f32.vlgmr.msra.gmra.mxu1 %vm187_vm1, %v262_v28 }
  0x86   : > { %699 = vmatpush3.msra.mxu1 %v599_v27  ;;  %714 = vmatprep.mubr.msk.f32.mxu1 %vm737_vm0, %v736_v1 }
  0x87   : > { %700 = vmatprep.subr.mxu1 %v736_v1 }
  0x88   : > { %701 = vmatpush3.msra.mxu1 %v598_v29  ;;  %v347_v31 = vpop.permute.xlu0 %346 }
  0x89   : > { %702 = vmatprep.subr.mxu1 %v736_v1  ;;  %696 = vmatmul.mubr.msk.f32.vlgmr.msra.gmra.mxu0 %vm187_vm1, %v347_v31 }
  0x8a   : > { %703 = vmatpush3.msra.mxu1 %v597_v30 }
  0x8b   : > { %704 = vmatprep.subr.mxu1 %v736_v1 }
  0x8c   : > { %705 = vmatpush3.msra.mxu1 %v596_v32 }
  0x8d   : > { %706 = vmatprep.subr.mxu1 %v736_v1 }
  0x8e   : > { %707 = vmatpush3.msra.mxu1 %v595_v33 }
  0x8f   : > { %708 = vmatprep.subr.mxu1 %v736_v1 }
  0x90   : > { %709 = vmatpush3.msra.mxu1 %v594_v34 }
  0x91   : > { %710 = vmatprep.subr.mxu1 %v736_v1 }
  0x92   : > { %711 = vmatpush3.msra.mxu1 %v593_v35 }
  0x93   : > { %712 = vmatprep.subr.mxu1 %v736_v1 }
  0x94   : > { %713 = vmatpush3.msra.mxu1 %v592_v36 }
  0x95   : > { %715 = vmatmul.mubr.msk.f32.vlgmr.msra.gmra.mxu1 %vm187_vm1, %v809_v11 }
  0xdc   : > { %v257_v37 = vpop.f32.mrf.mxu0 }
  0xde   : > { %v659_v38 = vpop.f32.mrf.mxu0 }
 0x145   : > { %v331_v39 = vpop.f32.mrf.mxu1 }
 0x146   : > { %v332_v43 = vadd.f32 %v331_v39, %v257_v37 }
 0x147   : > { %v678_v40 = vpop.f32.mrf.mxu1 }
 0x149   : > { %v416_v41 = vpop.f32.mrf.mxu0 }
 0x14a   : > { %v420_v44 = vadd.f32 %v416_v41, %v332_v43 }
 0x14b   : > { %v697_v42 = vpop.f32.mrf.mxu0 }
 0x155   : > { %v498_v45 = vpop.f32.mrf.mxu1 }
 0x156   : > { %v502_v47 = vadd.f32 %v498_v45, %v420_v44 }
 0x157   : > { %v716_v48 = vpop.f32.mrf.mxu1 }
 0x158   : > { %v510_v49 = vadd.f32 %v601_v46, %v502_v47 }
 0x15a   : > { %511 = vst.msk [vmem:[%s168_s11] sm:$0xff] %vm187_vm1, %v510_v49 }
 0x15b PF: > { %s13_s12 = sadd.s32 1, %s734_s12  }
 0x15c   : > { %p10_p4 = scmp.ge.s32.totalorder %s13_s12, 4  }
 0x15e   :  { %12 = sbr.rel (!%p10_p4) target bundleno = 1 (0x1), region = 65 }

// kernel: vectormap_transpose_conv2d.6
= control target key start
LH: loop header
LB: loop body
LE: loop exit
PB: predicated region body
PF: predicated region fallthrough
CT: control target
= control target key end

     0   :  { %s515_s12 = smov 0   ;;  %s590_s0 = inlined_call_operand.vmem [shape: f32[2,9,64], index: 0, kind: input, shape index: {}]   ;;  %s591_s1 = inlined_call_operand.vmem [shape: f32[2,64,64], index: 1, kind: input, shape index: {}]   ;;  %s592_s2 = inlined_call_operand.vmem [shape: f32[1,64], index: 2, kind: input, shape index: {}]   ;;  %s593_s3 = inlined_call_operand.vmem [shape: f32[2,8,64], index: 3, kind: output, shape index: {}]  }
   0x1 LB: > { %s397_s13 = sadd.s32 4294967295, %s491_s12   ;;  %p401_p0 = scmp.ge.s32.totalorder %s491_s12, 1  ;;  %s491_s12 = sphi %s515_s12, %s13_s12  }
   0x2   : > { %p137_p1 = scmp.lt.s32.totalorder %s491_s12, 3 }
   0x4   : > { %p138_p2 = pnand %p401_p0, %p137_p1 }
   0x5   : > { %p160_p3 = scmp.lt.s32.totalorder (!%p138_p2), %s397_s13, 1 }
   0x6   : > { %141 = sbr.rel (%p138_p2) target bundleno = 227 (0xe3), region = 32 }
   0xb   : > { %v412_v0 = vld [vmem:[%s591_s1 + $0x78] sm:$0xff]  ;;  %v493_v2 = vmov 0.0   ;;  %v411_v3 = vld [vmem:[%s591_s1 + $0x70] sm:$0xff]  ;;  %v410_v5 = vld [vmem:[%s591_s1 + $0x68] sm:$0xff]  ;;  %s595_s13 = smov (!%p160_p3, %s397_s13), 1  ;;  %vm188_vm0 = vcmask 523264  }
   0xc   : > { %v177_v1 = vld [vmem:[%s591_s1 + $0x38] sm:$0xff]  ;;  %437 = vmatprep.subr.mxu0 %v493_v2  ;;  %456 = vmatprep.subr.mxu1 %v493_v2  ;;  %v176_v4 = vld [vmem:[%s591_s1 + $0x30] sm:$0xff]  ;;  %v175_v6 = vld [vmem:[%s591_s1 + $0x28] sm:$0xff]  ;;  %s418_s11 = sshll.u32 %s595_s13, 4  ;;  %vm494_vm1 = vmmov 0   ;;  %s404_s25 = sshll.u32 %s595_s13, 3 }
   0xd   : > { %438 = vmatpush3.msra.mxu0 %v412_v0  ;;  %457 = vmatpush3.msra.mxu1 %v177_v1  ;;  %v409_v7 = vld [vmem:[%s591_s1 + $0x60] sm:$0xff]  ;;  %v408_v9 = vld [vmem:[%s591_s1 + $0x58] sm:$0xff]  ;;  %v407_v11 = vld [vmem:[%s591_s1 + $0x50] sm:$0xff]  ;;  %s164_s20 = scalar_lea.vmem %s590_s0, %s418_s11  ;;  %s168_s30 = scalar_lea.vmem %s593_s3, %s404_s25 }
   0xe   : > { %439 = vmatprep.subr.mxu0 %v493_v2  ;;  %458 = vmatprep.subr.mxu1 %v493_v2  ;;  %v174_v8 = vld [vmem:[%s591_s1 + $0x20] sm:$0xff]  ;;  %v173_v10 = vld [vmem:[%s591_s1 + $0x18] sm:$0xff]  ;;  %v172_v12 = vld [vmem:[%s591_s1 + $0x10] sm:$0xff] }
   0xf   : > { %440 = vmatpush3.msra.mxu0 %v411_v3  ;;  %459 = vmatpush3.msra.mxu1 %v176_v4  ;;  %v406_v13 = vld [vmem:[%s591_s1 + $0x48] sm:$0xff]  ;;  %v405_v15 = vld [vmem:[%s591_s1 + $0x40] sm:$0xff] }
  0x10   : > { %441 = vmatprep.subr.mxu0 %v493_v2  ;;  %460 = vmatprep.subr.mxu1 %v493_v2  ;;  %v171_v14 = vld [vmem:[%s591_s1 + $0x8] sm:$0xff]  ;;  %v170_v16 = vld [vmem:[%s591_s1] sm:$0xff] }
  0x11   : > { %442 = vmatpush3.msra.mxu0 %v410_v5  ;;  %461 = vmatpush3.msra.mxu1 %v175_v6  ;;  %v178_v17 = vld [vmem:[%s164_s20] sm:$0xff] }
  0x12   : > { %443 = vmatprep.subr.mxu0 %v493_v2  ;;  %462 = vmatprep.subr.mxu1 %v493_v2  ;;  %v169_v18 = vld [vmem:[%s164_s20 + $0x1] sm:$0xff]  ;;  %v415_v21 = vld [vmem:[%s592_s2] ss:$0 sm:$0xff] }
  0x13   : > { %444 = vmatpush3.msra.mxu0 %v409_v7  ;;  %463 = vmatpush3.msra.mxu1 %v174_v8 }
  0x14   : > { %445 = vmatprep.subr.mxu0 %v493_v2  ;;  %464 = vmatprep.subr.mxu1 %v493_v2 }
  0x15   : > { %446 = vmatpush3.msra.mxu0 %v408_v9  ;;  %465 = vmatpush3.msra.mxu1 %v173_v10 }
  0x16   : > { %447 = vmatprep.subr.mxu0 %v493_v2  ;;  %466 = vmatprep.subr.mxu1 %v493_v2 }
  0x17   : > { %448 = vmatpush3.msra.mxu0 %v407_v11  ;;  %467 = vmatpush3.msra.mxu1 %v172_v12 }
  0x18   : > { %449 = vmatprep.subr.mxu0 %v493_v2  ;;  %468 = vmatprep.subr.mxu1 %v493_v2 }
  0x19   : > { %450 = vmatpush3.msra.mxu0 %v406_v13  ;;  %469 = vmatpush3.msra.mxu1 %v171_v14 }
  0x1a   : > { %451 = vmatprep.subr.mxu0 %v493_v2  ;;  %470 = vmatprep.subr.mxu1 %v493_v2 }
  0x1b   : > { %452 = vmatpush3.msra.mxu0 %v405_v15  ;;  %453 = vmatprep.mubr.msk.f32.mxu0 %vm494_vm1, %v493_v2 }
  0x1c   : > { %471 = vmatpush3.msra.mxu1 %v170_v16  ;;  %472 = vmatprep.mubr.msk.f32.mxu1 %vm494_vm1, %v493_v2 }
  0x1d   : > { %454 = vmatmul.mubr.msk.f32.vlgmr.msra.gmra.mxu0 %vm188_vm0, %v178_v17  ;;  %473 = vmatmul.mubr.msk.f32.vlgmr.msra.gmra.mxu1 %vm188_vm0, %v169_v18 }
  0xdd   : > { %v258_v19 = vpop.f32.mrf.mxu0  ;;  %v331_v20 = vpop.f32.mrf.mxu1 }
  0xde   : > { %v332_v22 = vadd.f32 %v331_v20, %v258_v19 }
  0xdf   : > { %v455_v23 = vpop.f32.mrf.mxu0  ;;  %v474_v24 = vpop.f32.mrf.mxu1 }
  0xe0   : > { %v342_v25 = vadd.f32 %v415_v21, %v332_v22 }
  0xe2   : > { %343 = vst.msk [vmem:[%s168_s30] sm:$0xff] %vm188_vm0, %v342_v25 }
  0xe3 PF: > { %s13_s12 = sadd.s32 1, %s491_s12  }
  0xe4   : > { %p10_p4 = scmp.ge.s32.totalorder %s13_s12, 4  }
  0xe6   :  { %12 = sbr.rel (!%p10_p4) target bundleno = 1 (0x1), region = 63 }

// kernel: vectormap_transpose_conv2d.5
= control target key start
LH: loop header
LB: loop body
LE: loop exit
PB: predicated region body
PF: predicated region fallthrough
CT: control target
= control target key end

     0   :  { %s512_s12 = smov 0   ;;  %s590_s0 = inlined_call_operand.vmem [shape: f32[2,8,72], index: 0, kind: input, shape index: {}]   ;;  %s591_s1 = inlined_call_operand.vmem [shape: f32[2,64,64], index: 1, kind: input, shape index: {}]   ;;  %s592_s2 = inlined_call_operand.vmem [shape: f32[1,64], index: 2, kind: input, shape index: {}]   ;;  %s593_s3 = inlined_call_operand.vmem [shape: f32[2,8,64], index: 3, kind: output, shape index: {}]  }
   0x1 LB: > { %s394_s13 = sadd.s32 4294967295, %s487_s12   ;;  %p398_p0 = scmp.ge.s32.totalorder %s487_s12, 1  ;;  %s487_s12 = sphi %s512_s12, %s13_s12  }
   0x2   : > { %p136_p1 = scmp.lt.s32.totalorder %s487_s12, 3 }
   0x4   : > { %p137_p2 = pnand %p398_p0, %p136_p1 }
   0x5   : > { %p158_p3 = scmp.lt.s32.totalorder (!%p137_p2), %s394_s13, 1  ;;  %s490_s7 = smov (!%p137_p2), 120  }
   0x6   : > { %140 = sbr.rel (%p137_p2) target bundleno = 331 (0x14b), region = 32 }
   0xb   : > { %v408_v0 = vld [vmem:[%s591_s1 + $0x78] sm:$0xff]  ;;  %v489_v2 = vmov 0.0   ;;  %v407_v3 = vld [vmem:[%s591_s1 + $0x70] sm:$0xff]  ;;  %s595_s13 = smov (!%p158_p3, %s394_s13), 1  ;;  %v406_v5 = vld [vmem:[%s591_s1 + $0x68] sm:$0xff]  ;;  %vm184_vm0 = vcmask 523264  }
   0xc   : > { %v174_v1 = vld [vmem:[%s591_s1 + $0x38] sm:$0xff]  ;;  %432 = vmatprep.subr.mxu0 %v489_v2  ;;  %451 = vmatprep.subr.mxu1 %v489_v2  ;;  %v173_v4 = vld [vmem:[%s591_s1 + $0x30] sm:$0xff]  ;;  %v172_v6 = vld [vmem:[%s591_s1 + $0x28] sm:$0xff]  ;;  %s399_s26 = sshll.u32 %s595_s13, 3  ;;  %vm491_vm1 = vmmov 0  }
   0xd   : > { %433 = vmatpush3.msra.mxu0 %v408_v0  ;;  %452 = vmatpush3.msra.mxu1 %v174_v1  ;;  %s161_s29 = scalar_lea.vmem %s590_s0, %s399_s26  ;;  %v405_v7 = vld [vmem:[%s591_s1 + $0x60] sm:$0xff]  ;;  %v404_v10 = vld [vmem:[%s591_s1 + $0x58] sm:$0xff]  ;;  %v403_v12 = vld [vmem:[%s591_s1 + $0x50] sm:$0xff]  ;;  %s165_s4 = scalar_lea.vmem %s593_s3, %s399_s26 }
   0xe   : > { %434 = vmatprep.subr.mxu0 %v489_v2  ;;  %453 = vmatprep.subr.mxu1 %v489_v2  ;;  %v166_v8 = vld [vmem:[%s161_s29] sm:$0xff]  ;;  %v170_v11 = vld [vmem:[%s591_s1 + $0x18] sm:$0xff]  ;;  %v169_v13 = vld [vmem:[%s591_s1 + $0x10] sm:$0xff] }
   0xf   : > { %435 = vmatpush3.msra.mxu0 %v407_v3  ;;  %454 = vmatpush3.msra.mxu1 %v173_v4  ;;  %v171_v9 = vld [vmem:[%s591_s1 + $0x20] sm:$0xff]  ;;  %v402_v14 = vld [vmem:[%s591_s1 + $0x48] sm:$0xff] }
  0x10   : > { %436 = vmatprep.subr.mxu0 %v489_v2  ;;  %455 = vmatprep.subr.mxu1 %v489_v2  ;;  %v401_v15 = vld [vmem:[%s591_s1 + $0x40] sm:$0xff]  ;;  %v168_v16 = vld [vmem:[%s591_s1 + $0x8] sm:$0xff] }
  0x11   : > { %437 = vmatpush3.msra.mxu0 %v406_v5  ;;  %456 = vmatpush3.msra.mxu1 %v172_v6  ;;  %v167_v17 = vld [vmem:[%s591_s1] sm:$0xff] }
  0x12   : > { %258 = vrot.lane.b32.xlu0 %v166_v8, %s490_s7  ;;  %438 = vmatprep.subr.mxu0 %v489_v2  ;;  %v411_v22 = vld [vmem:[%s592_s2] ss:$0 sm:$0xff] }
  0x13   : > { %439 = vmatpush3.msra.mxu0 %v405_v7  ;;  %457 = vmatprep.subr.mxu1 %v489_v2 }
  0x14   : > { %440 = vmatprep.subr.mxu0 %v489_v2  ;;  %458 = vmatpush3.msra.mxu1 %v171_v9 }
  0x15   : > { %441 = vmatpush3.msra.mxu0 %v404_v10  ;;  %459 = vmatprep.subr.mxu1 %v489_v2 }
  0x16   : > { %442 = vmatprep.subr.mxu0 %v489_v2  ;;  %460 = vmatpush3.msra.mxu1 %v170_v11 }
  0x17   : > { %443 = vmatpush3.msra.mxu0 %v403_v12  ;;  %461 = vmatprep.subr.mxu1 %v489_v2 }
  0x18   : > { %444 = vmatprep.subr.mxu0 %v489_v2  ;;  %462 = vmatpush3.msra.mxu1 %v169_v13 }
  0x19   : > { %445 = vmatpush3.msra.mxu0 %v402_v14  ;;  %463 = vmatprep.subr.mxu1 %v489_v2 }
  0x1a   : > { %446 = vmatprep.subr.mxu0 %v489_v2  ;;  %448 = vmatprep.mubr.msk.f32.mxu0 %vm491_vm1, %v489_v2 }
  0x1b   : > { %447 = vmatpush3.msra.mxu0 %v401_v15  ;;  %464 = vmatpush3.msra.mxu1 %v168_v16 }
  0x1c   : > { %449 = vmatmul.mubr.msk.f32.vlgmr.msra.gmra.mxu0 %vm184_vm0, %v166_v8  ;;  %465 = vmatprep.subr.mxu1 %v489_v2 }
  0x1d   : > { %466 = vmatpush3.msra.mxu1 %v167_v17  ;;  %467 = vmatprep.mubr.msk.f32.mxu1 %vm491_vm1, %v489_v2 }
  0x84   : > { %v259_v18 = vpop.permute.xlu0 %258 }
  0x85   : > { %468 = vmatmul.mubr.msk.f32.vlgmr.msra.gmra.mxu1 %vm184_vm0, %v259_v18 }
  0xdc   : > { %v254_v19 = vpop.f32.mrf.mxu0 }
  0xde   : > { %v450_v20 = vpop.f32.mrf.mxu0 }
 0x145   : > { %v328_v21 = vpop.f32.mrf.mxu1 }
 0x146   : > { %v329_v23 = vadd.f32 %v328_v21, %v254_v19 }
 0x147   : > { %v469_v24 = vpop.f32.mrf.mxu1 }
 0x148   : > { %v339_v25 = vadd.f32 %v411_v22, %v329_v23 }
 0x14a   : > { %340 = vst.msk [vmem:[%s165_s4] sm:$0xff] %vm184_vm0, %v339_v25 }
 0x14b PF: > { %s13_s12 = sadd.s32 1, %s487_s12  }
 0x14c   : > { %p10_p4 = scmp.ge.s32.totalorder %s13_s12, 4  }
 0x14e   :  { %12 = sbr.rel (!%p10_p4) target bundleno = 1 (0x1), region = 63 }

// kernel: vectormap_transpose_conv2d.4
= control target key start
LH: loop header
LB: loop body
LE: loop exit
PB: predicated region body
PF: predicated region fallthrough
CT: control target
= control target key end

     0   :  { %s389_s12 = smov 0   ;;  %s433_s0 = inlined_call_operand.vmem [shape: f32[2,8,64], index: 0, kind: input, shape index: {}]   ;;  %s434_s1 = inlined_call_operand.vmem [shape: f32[1,64,64], index: 1, kind: input, shape index: {}]   ;;  %s435_s2 = inlined_call_operand.vmem [shape: f32[1,64], index: 2, kind: input, shape index: {}]   ;;  %s436_s3 = inlined_call_operand.vmem [shape: f32[2,8,64], index: 3, kind: output, shape index: {}]  }
   0x1 LB: > { %s310_s13 = sadd.s32 4294967295, %s365_s12   ;;  %p314_p0 = scmp.ge.s32.totalorder %s365_s12, 1  ;;  %s365_s12 = sphi %s389_s12, %s13_s12  }
   0x2   : > { %p136_p1 = scmp.lt.s32.totalorder %s365_s12, 3 }
   0x4   : > { %p137_p2 = pnand %p314_p0, %p136_p1 }
   0x5   : > { %p158_p3 = scmp.lt.s32.totalorder (!%p137_p2), %s310_s13, 1 }
   0x6   : > { %140 = sbr.rel (%p137_p2) target bundleno = 224 (0xe0), region = 32 }
   0xb   : > { %v174_v0 = vld [vmem:[%s434_s1 + $0x38] sm:$0xff]  ;;  %v367_v1 = vmov 0.0   ;;  %v173_v2 = vld [vmem:[%s434_s1 + $0x30] sm:$0xff]  ;;  %vm368_vm0 = vmmov 0   ;;  %v172_v3 = vld [vmem:[%s434_s1 + $0x28] sm:$0xff]  ;;  %s438_s13 = smov (!%p158_p3, %s310_s13), 1 }
   0xc   : > { %330 = vmatprep.subr.mxu0 %v367_v1  ;;  %346 = vmatprep.mubr.msk.f32.mxu0 %vm368_vm0, %v367_v1  ;;  %v171_v4 = vld [vmem:[%s434_s1 + $0x20] sm:$0xff]  ;;  %v170_v5 = vld [vmem:[%s434_s1 + $0x18] sm:$0xff]  ;;  %s315_s24 = sshll.u32 %s438_s13, 3  ;;  %v169_v6 = vld [vmem:[%s434_s1 + $0x10] sm:$0xff]  ;;  %vm182_vm1 = vcmask 523264  }
   0xd   : > { %331 = vmatpush3.msra.mxu0 %v174_v0  ;;  %v168_v7 = vld [vmem:[%s434_s1 + $0x8] sm:$0xff]  ;;  %s161_s4 = scalar_lea.vmem %s433_s0, %s315_s24  ;;  %v167_v8 = vld [vmem:[%s434_s1] sm:$0xff]  ;;  %s165_s11 = scalar_lea.vmem %s436_s3, %s315_s24 }
   0xe   : > { %332 = vmatprep.subr.mxu0 %v367_v1  ;;  %v166_v9 = vld [vmem:[%s161_s4] sm:$0xff] }
   0xf   : > { %333 = vmatpush3.msra.mxu0 %v173_v2  ;;  %v317_v10 = vld [vmem:[%s435_s2] ss:$0 sm:$0xff] }
  0x10   : > { %334 = vmatprep.subr.mxu0 %v367_v1 }
  0x11   : > { %335 = vmatpush3.msra.mxu0 %v172_v3 }
  0x12   : > { %336 = vmatprep.subr.mxu0 %v367_v1 }
  0x13   : > { %337 = vmatpush3.msra.mxu0 %v171_v4 }
  0x14   : > { %338 = vmatprep.subr.mxu0 %v367_v1 }
  0x15   : > { %339 = vmatpush3.msra.mxu0 %v170_v5 }
  0x16   : > { %340 = vmatprep.subr.mxu0 %v367_v1 }
  0x17   : > { %341 = vmatpush3.msra.mxu0 %v169_v6 }
  0x18   : > { %342 = vmatprep.subr.mxu0 %v367_v1 }
  0x19   : > { %343 = vmatpush3.msra.mxu0 %v168_v7 }
  0x1a   : > { %344 = vmatprep.subr.mxu0 %v367_v1 }
  0x1b   : > { %345 = vmatpush3.msra.mxu0 %v167_v8 }
  0x1c   : > { %347 = vmatmul.mubr.msk.f32.vlgmr.msra.gmra.mxu0 %vm182_vm1, %v166_v9 }
  0xdc   : > { %v252_v11 = vpop.f32.mrf.mxu0 }
  0xdd   : > { %v253_v12 = vadd.f32 %v317_v10, %v252_v11 }
  0xde   : > { %v348_v13 = vpop.f32.mrf.mxu0 }
  0xdf   : > { %256 = vst.msk [vmem:[%s165_s11] sm:$0xff] %vm182_vm1, %v253_v12 }
  0xe0 PF: > { %s13_s12 = sadd.s32 1, %s365_s12  }
  0xe1   : > { %p10_p4 = scmp.ge.s32.totalorder %s13_s12, 4  }
  0xe3   :  { %12 = sbr.rel (!%p10_p4) target bundleno = 1 (0x1), region = 62 }

</bundles_post_ra>
